<compile_context>
chip_gen: v7x
topology: tpu7x:2x2x1
jax: 0.10.0
libtpu: 0.0.40
codegen_flags: <defaults>
</compile_context>

<pallas_src>
import jax
import jax.numpy as jnp
from jax.experimental import pallas as pl
from jax.experimental.pallas import tpu as pltpu


# ----------------------------------------------------------------------------
# Kernels
# ----------------------------------------------------------------------------
def _matmul_kernel_f32(x_ref, w_ref, o_ref):
    """f32 output: accumulate directly into the resident output block."""
    @pl.when(pl.program_id(2) == 0)
    def _():
        o_ref[...] = jnp.zeros_like(o_ref)

    o_ref[...] += jnp.dot(
        x_ref[...], w_ref[...], preferred_element_type=jnp.float32
    )


def _matmul_kernel_acc(x_ref, w_ref, o_ref, acc_ref):
    """Low-precision output: f32 VMEM accumulator, cast on the last K step."""
    @pl.when(pl.program_id(2) == 0)
    def _():
        acc_ref[...] = jnp.zeros_like(acc_ref)

    acc_ref[...] += jnp.dot(
        x_ref[...], w_ref[...], preferred_element_type=jnp.float32
    )

    @pl.when(pl.program_id(2) == pl.num_programs(2) - 1)
    def _():
        o_ref[...] = acc_ref[...].astype(o_ref.dtype)


# ----------------------------------------------------------------------------
# Tiling helpers
# ----------------------------------------------------------------------------
def _round_up(x: int, m: int) -> int:
    return ((x + m - 1) // m) * m


def _cdiv(a: int, b: int) -> int:
    return (a + b - 1) // b


def _hw_vmem_bytes() -> int:
    """Best-effort VMEM capacity query; conservative 64 MiB (v7x) fallback."""
    try:
        return int(pltpu.get_tpu_info().vmem_capacity_bytes)
    except Exception:
        return 64 << 20


def _sublane_multiple(dtype) -> int:
    """Native sublane tile height per dtype: (8,128) f32, (16,128) bf16, (32,128) i8."""
    itemsize = jnp.dtype(dtype).itemsize
    if itemsize >= 4:
        return 8
    if itemsize == 2:
        return 16
    return 32


def _pick_k_tile(K: int, dtype) -> int:
    """Deep K tiles: amortize the per-k accumulator RMW (vst slot on v5e)."""
    tk_cap = 2048 if jnp.dtype(dtype).itemsize <= 2 else 1024
    return min(_round_up(K, 128), tk_cap)


def _pick_mn_tiles(M: int, N: int, dtype, vmem_bytes: int) -> tuple:
    """Large M/N tiles -> MXU-bound.

    Arithmetic intensity of this K-last schedule is ~1/(1/tm+1/tn) flops per
    operand byte re-streamed; 512x1024 gives ~340 flops/byte, above every
    listed generation's compute/HBM ratio, while the double/triple-buffered
    working set stays ~10-20 MiB (fits even v7x's 64 MiB VMEM easily).
    """
    sub = _sublane_multiple(dtype)
    tm = min(_round_up(M, sub), 512)
    tn = min(_round_up(N, 128), 1024)   # cap is 256-aligned (v6e/v7x MXU width)
    # v7x-class chip (<=64 MiB VMEM, 2 TensorCores): if the two parallel grid
    # axes would expose only one block, split N so both cores get work.
    if vmem_bytes <= (64 << 20) and _cdiv(M, tm) * _cdiv(N, tn) < 2 and N > 256:
        tn = max(256, _round_up(_cdiv(N, 2), 128))
    return tm, tn


# ----------------------------------------------------------------------------
# Tiled matmul wrapper
# ----------------------------------------------------------------------------
_W_BUFFERS = 3  # weight-stream pipeline depth; falls back to 2 if unsupported


def _matmul(x2d, w_t, *, tm, tn, tk, out_dtype=None):
    global _W_BUFFERS
    try:
        return _matmul_impl(x2d, w_t, tm=tm, tn=tn, tk=tk,
                            out_dtype=out_dtype, w_buffers=_W_BUFFERS)
    except Exception:
        if _W_BUFFERS == 2:
            raise
        _W_BUFFERS = 2  # pipeline_mode unsupported here; stick to default.
        return _matmul_impl(x2d, w_t, tm=tm, tn=tn, tk=tk,
                            out_dtype=out_dtype, w_buffers=2)


def _matmul_impl(x2d, w_t, *, tm, tn, tk, out_dtype, w_buffers):
    """(M, K) @ (K, N) with a K-last reduction grid.

    K must divide tk exactly (callers zero-pad K once); M and N may be ragged
    -- edge blocks read garbage rows/cols that only affect garbage output
    rows/cols, and Pallas clips the edge writebacks, so the in-bounds result
    is exact with no in-kernel masking.
    """
    M, K = x2d.shape
    K2, N = w_t.shape
    assert K == K2, (K, K2)
    assert K % tk == 0, (K, tk)

    out_dtype = jnp.dtype(out_dtype or x2d.dtype)
    f32_out = out_dtype == jnp.dtype(jnp.float32)
    in_itemsize = jnp.dtype(x2d.dtype).itemsize
    w_itemsize = jnp.dtype(w_t.dtype).itemsize
    out_itemsize = out_dtype.itemsize

    grid = (_cdiv(M, tm), _cdiv(N, tn), K // tk)

    kernel = _matmul_kernel_f32 if f32_out else _matmul_kernel_acc
    scratch = [] if f32_out else [pltpu.VMEM((tm, tn), jnp.float32)]

    if w_buffers == 2:
        w_spec = pl.BlockSpec((tk, tn), lambda i, j, k: (k, j))
    else:
        w_spec = pl.BlockSpec((tk, tn), lambda i, j, k: (k, j),
                              pipeline_mode=pl.Buffered(w_buffers))

    # VMEM budget: buffered inputs + double-buffered output (+ f32 acc).
    hw_vmem = _hw_vmem_bytes()
    vmem_needed = (2 * tm * tk * in_itemsize
                   + max(w_buffers, 2) * tk * tn * w_itemsize
                   + 2 * tm * tn * out_itemsize
                   + (0 if f32_out else tm * tn * 4))
    # Clamp to physical capacity minus headroom (v7x-safe).
    vmem_limit = min(max(vmem_needed + vmem_needed // 2 + (2 << 20), 32 << 20),
                     hw_vmem - (8 << 20))

    cost = pl.CostEstimate(
        flops=2 * M * N * K,
        transcendentals=0,
        bytes_accessed=(M * K * in_itemsize + K * N * w_itemsize
                        + M * N * out_itemsize),
    )

    return pl.pallas_call(
        kernel,
        out_shape=jax.ShapeDtypeStruct((M, N), out_dtype),
        grid_spec=pltpu.PrefetchScalarGridSpec(
            num_scalar_prefetch=0,
            grid=grid,
            in_specs=[
                pl.BlockSpec((tm, tk), lambda i, j, k: (i, k)),
                w_spec,
            ],
            out_specs=pl.BlockSpec((tm, tn), lambda i, j, k: (i, j)),
            scratch_shapes=scratch,
        ),
        compiler_params=pltpu.CompilerParams(
            dimension_semantics=("parallel", "parallel", "arbitrary"),
            vmem_limit_bytes=vmem_limit,
        ),
        cost_estimate=cost,
    )(x2d, w_t)


# ----------------------------------------------------------------------------
# Module
# ----------------------------------------------------------------------------
class ColumnParallelLinear:
    """JAX/Pallas equivalent of the PyTorch ColumnParallelLinear (tp_size=1).

    Note: the PyTorch module creates nn.Linear(..., bias=False) regardless of
    the `bias` argument, so no bias parameter exists here either.
    """

    def __init__(self, input_dim: int, output_dim: int, bias: bool = True,
                 dtype=jnp.float32, tp_size: int = 1, key=None):
        self.input_dim = input_dim
        self.output_dim_local = output_dim // tp_size
        self.dtype = jnp.dtype(dtype)
        if key is None:
            key = jax.random.PRNGKey(0)
        # Deterministic init mimicking nn.Linear's kaiming-uniform bound.
        bound = 1.0 / (input_dim ** 0.5)
        # Weight stored like torch: (out_local, in).
        self.weight = jax.random.uniform(
            key, (self.output_dim_local, input_dim),
            minval=-bound, maxval=bound, dtype=dtype,
        )
        # Pre-transpose to (K, N) and zero-pad K ONCE at init so every forward
        # is a plain row-major dot with no per-call HBM transpose/pad copy of
        # the weight.  (Zero K-padding keeps the reduction exact.)
        self._tk = _pick_k_tile(input_dim, self.dtype)
        self._kp = _round_up(input_dim, self._tk)
        w_t = self.weight.T
        if self._kp != input_dim:
            w_t = jnp.pad(w_t, ((0, self._kp - input_dim), (0, 0)))
        self.w_t = jnp.asarray(w_t)

    def __call__(self, x):
        # f.apply(x) is identity in forward (backward-only TP all-reduce).
        orig_shape = x.shape
        D = orig_shape[-1]
        assert D == self.input_dim, (D, self.input_dim)
        x2d = x.reshape(-1, D)
        M = x2d.shape[0]
        N = self.output_dim_local

        # Only the reduction axis needs zero padding; ragged M/N are handled
        # by cdiv grids + clipped edge writes (no extra HBM copies of x/out).
        if self._kp != D:
            x2d = jnp.pad(x2d, ((0, 0), (0, self._kp - D)))

        tm, tn = _pick_mn_tiles(M, N, x2d.dtype, _hw_vmem_bytes())
        out = _matmul(x2d, self.w_t, tm=tm, tn=tn, tk=self._tk,
                      out_dtype=x.dtype)
        return out.reshape(*orig_shape[:-1], N)


def _reference(x, weight):
    return jnp.einsum("...d,nd->...n", x, weight)


# ----------------------------------------------------------------------------
# Demo / checks
# ----------------------------------------------------------------------------
if __name__ == "__main__":
    key = jax.random.PRNGKey(0)
    kx, kw, kx2, kw2, kx3, kw3 = jax.random.split(key, 6)

    # --- small demo shape (matches the module's nn.Linear semantics) ---
    batch, seq, input_dim, output_dim = 2, 8, 32, 64
    x = jax.random.normal(kx, (batch, seq, input_dim), dtype=jnp.float32)
    layer = ColumnParallelLinear(input_dim, output_dim, bias=True,
                                 dtype=jnp.float32, tp_size=1, key=kw)
    out = jax.block_until_ready(layer(x))
    ref = _reference(x, layer.weight)
    assert out.shape == (batch, seq, output_dim), out.shape
    assert jnp.allclose(out, ref, atol=1e-5, rtol=1e-5), "small-shape mismatch"

    # --- larger sanity check: exercises a full-depth K reduction tile ---
    b2, s2, d2, o2 = 2, 256, 1024, 512
    x2 = jax.random.normal(kx2, (b2, s2, d2), dtype=jnp.float32)
    layer2 = ColumnParallelLinear(d2, o2, bias=False,
                                  dtype=jnp.float32, tp_size=1, key=kw2)
    out2 = jax.block_until_ready(layer2(x2))
    ref2 = _reference(x2, layer2.weight)
    assert out2.shape == (b2, s2, o2), out2.shape
    # Loose tolerance: reference einsum uses XLA's default f32 matmul precision,
    # which can differ slightly from the Pallas MXU path at K=1024.
    assert jnp.allclose(out2, ref2, atol=2e-2, rtol=2e-2), "tiled-shape mismatch"

    # --- ragged sanity check: M not a multiple of the tile (cdiv grid path) ---
    b3, s3, d3, o3 = 2, 300, 256, 384
    x3 = jax.random.normal(kx3, (b3, s3, d3), dtype=jnp.float32)
    layer3 = ColumnParallelLinear(d3, o3, bias=False,
                                  dtype=jnp.float32, tp_size=1, key=kw3)
    out3 = jax.block_until_ready(layer3(x3))
    ref3 = _reference(x3, layer3.weight)
    assert out3.shape == (b3, s3, o3), out3.shape
    assert jnp.allclose(out3, ref3, atol=2e-2, rtol=2e-2), "ragged-shape mismatch"

    print("KERNEL_OK")
</pallas_src>

<mosaic_0001>
module attributes {stable_mosaic.version = 11 : i64} {
  func.func @_matmul_kernel_f32(%arg0: i32, %arg1: i32, %arg2: i32, %arg3: memref<16x128xf32, #tpu.memory_space<vmem>>, %arg4: memref<128x128xf32, #tpu.memory_space<vmem>>, %arg5: memref<16x128xf32, #tpu.memory_space<vmem>>) attributes {dimension_semantics = [#tpu.dimension_semantics<parallel>, #tpu.dimension_semantics<parallel>, #tpu.dimension_semantics<arbitrary>], iteration_bounds = array<i64: 1, 1, 1>, scalar_prefetch = 0 : i64, scratch_operands = 0 : i64, tpu.core_type = #tpu.core_type<tc>, window_params = [{transform_indices = @transform_0, window_bounds = array<i64: 16, 128>}, {transform_indices = @transform_1, window_bounds = array<i64: 128, 128>}, {transform_indices = @transform_2, window_bounds = array<i64: 16, 128>}]} {
    %c0_i32 = arith.constant 0 : i32
    %0 = arith.cmpi eq, %arg2, %c0_i32 : i32
    %1 = arith.extui %0 : i1 to i32
    %c0_i32_0 = arith.constant 0 : i32
    %2 = arith.cmpi ne, %1, %c0_i32_0 : i32
    scf.if %2 {
      %cst_8 = arith.constant 0.000000e+00 : f32
      %9 = vector.broadcast %cst_8 : f32 to vector<16x128xf32>
      %c0_9 = arith.constant 0 : index
      %c0_10 = arith.constant 0 : index
      %10 = vector.load %arg5[%c0_9, %c0_10] : memref<16x128xf32, #tpu.memory_space<vmem>>, vector<16x128xf32>
      tpu.vector_store %arg5[%c0_9, %c0_10], %9 {strides = array<i32>} : memref<16x128xf32, #tpu.memory_space<vmem>>, vector<16x128xf32>,
    } else {
    }
    %c0 = arith.constant 0 : index
    %c0_1 = arith.constant 0 : index
    %3 = vector.load %arg5[%c0, %c0_1] : memref<16x128xf32, #tpu.memory_space<vmem>>, vector<16x128xf32>
    %c0_2 = arith.constant 0 : index
    %c0_3 = arith.constant 0 : index
    %4 = vector.load %arg3[%c0_2, %c0_3] : memref<16x128xf32, #tpu.memory_space<vmem>>, vector<16x128xf32>
    %c0_4 = arith.constant 0 : index
    %c0_5 = arith.constant 0 : index
    %5 = vector.load %arg4[%c0_4, %c0_5] : memref<128x128xf32, #tpu.memory_space<vmem>>, vector<128x128xf32>
    %cst = arith.constant dense<0.000000e+00> : vector<16x128xf32>
    %6 = tpu.matmul %4, %5, %cst {dimension_numbers = #tpu.dot_dimension_numbers<[1], [0], [0], [1], [0, 0, 1, 1], [], []>} : vector<16x128xf32>, vector<128x128xf32>, vector<16x128xf32> -> vector<16x128xf32>
    %7 = arith.addf %3, %6 : vector<16x128xf32>
    %c0_6 = arith.constant 0 : index
    %c0_7 = arith.constant 0 : index
    %8 = vector.load %arg5[%c0_6, %c0_7] : memref<16x128xf32, #tpu.memory_space<vmem>>, vector<16x128xf32>
    tpu.vector_store %arg5[%c0_6, %c0_7], %7 {strides = array<i32>} : memref<16x128xf32, #tpu.memory_space<vmem>>, vector<16x128xf32>,
    return
  }
  func.func @transform_0(%arg0: i32, %arg1: i32, %arg2: i32) -> (i32, i32) {
    %c0_i32 = arith.constant 0 : i32
    return %arg0, %arg2 : i32, i32
  }
  func.func @transform_1(%arg0: i32, %arg1: i32, %arg2: i32) -> (i32, i32) {
    %c0_i32 = arith.constant 0 : i32
    return %arg2, %arg1 : i32, i32
  }
  func.func @transform_2(%arg0: i32, %arg1: i32, %arg2: i32) -> (i32, i32) {
    %c0_i32 = arith.constant 0 : i32
    return %arg0, %arg1 : i32, i32
  }
}

</mosaic_0001>

<bundles_post_ra>
// kernel: tpu_custom_call.1
= control target key start
LH: loop header
LB: loop body
LE: loop exit
PB: predicated region body
PF: predicated region fallthrough
CT: control target
= control target key end

     0   :  { %s330_s0 = inlined_call_operand.vmem [shape: f32[16,128], index: 0, kind: input, shape index: {}]   ;;  %s331_s1 = inlined_call_operand.vmem [shape: f32[128,64], index: 1, kind: input, shape index: {}]   ;;  %s332_s2 = inlined_call_operand.hbm [shape: f32[16,64], index: 2, kind: output, shape index: {}]  }
   0x1   :  { %v22_v0 = vld [vmem:[%s331_s1] sm:$0xff]  ;;  %v23_v1 = vld [vmem:[%s331_s1 + $0x8] sm:$0xff]  ;;  %v24_v2 = vld [vmem:[%s331_s1 + $0x10] sm:$0xff] }
   0x2   :  { %v186_v3 = vpack.c.bf16 %v23_v1, %v22_v0  ;;  %v25_v4 = vld [vmem:[%s331_s1 + $0x18] sm:$0xff]  ;;  %v26_v6 = vld [vmem:[%s331_s1 + $0x20] sm:$0xff]  ;;  %v27_v7 = vld [vmem:[%s331_s1 + $0x28] sm:$0xff] }
   0x3   :  { %v190_v5 = vpack.c.bf16 %v25_v4, %v24_v2  ;;  %v194_v8 = vpack.c.bf16 %v27_v7, %v26_v6  ;;  %v20_v9 = vld [vmem:[%s330_s0] sm:$0xff]  ;;  %v28_v10 = vld [vmem:[%s331_s1 + $0x30] sm:$0xff]  ;;  %v29_v11 = vld [vmem:[%s331_s1 + $0x38] sm:$0xff] }
   0x4   :  { %187 = vmatprep.subr.bf16.mxu0 %v186_v3  ;;  %183 = vmatprep.mubr.f32.mxu0 %v20_v9 }
   0x5   :  { %189 = vmatpush3.bf16.msra.mxu0 %v186_v3 }
   0x6   :  { %191 = vmatprep.subr.bf16.mxu0 %v190_v5 }
   0x7   :  { %7 = vsyncpa [#allocation3], 0  ;;  %v198_v12 = vpack.c.bf16 %v29_v11, %v28_v10  ;;  %v30_v13 = vld [vmem:[%s331_s1 + $0x40] sm:$0xff]  ;;  %v31_v14 = vld [vmem:[%s331_s1 + $0x48] sm:$0xff]  ;;  %s246_s17 = smov [#allocation2]  }
   0x8   :  { %v202_v15 = vpack.c.bf16 %v31_v14, %v30_v13  ;;  %v32_v16 = vld [vmem:[%s331_s1 + $0x50] sm:$0xff]  ;;  %v33_v17 = vld [vmem:[%s331_s1 + $0x58] sm:$0xff]  ;;  %v34_v19 = vld [vmem:[%s331_s1 + $0x60] sm:$0xff]  ;;  %s122_s18 = sshll.u32 %s246_s17, 4  ;;  %s123_s18 = int_to_ptr.vmem [resolvable:$true] %s122_s18 }
   0x9   :  { %193 = vmatpush3.bf16.msra.mxu0 %v190_v5  ;;  %v206_v18 = vpack.c.bf16 %v33_v17, %v32_v16  ;;  %v35_v20 = vld [vmem:[%s331_s1 + $0x68] sm:$0xff]  ;;  %v36_v22 = vld [vmem:[%s331_s1 + $0x70] sm:$0xff]  ;;  %v37_v23 = vld [vmem:[%s331_s1 + $0x78] sm:$0xff]  ;;  %s222_s19 = scalar_lea.vmem %s123_s18, 256  ;;  %p227_p1 = scmp.lt.s32.totalorder %s123_s18, %s123_s18 }
   0xa   :  { %195 = vmatprep.subr.bf16.mxu0 %v194_v8  ;;  %v210_v21 = vpack.c.bf16 %v35_v20, %v34_v19  ;;  %v214_v24 = vpack.c.bf16 %v37_v23, %v36_v22  ;;  %v21_v25 = vld [vmem:[%s330_s0 + $0x8] sm:$0xff]  ;;  %p223_p0 = scmp.ne.s32.totalorder %s123_s18, %s222_s19  ;;  %p228_p2 = scmp.lt.s32.totalorder %s222_s19, %s222_s19 }
   0xc   :  { %p229_p3 = por %p228_p2, %p227_p1 }
   0xd   :  { %197 = vmatpush3.bf16.msra.mxu0 %v194_v8 }
   0xe   :  { %199 = vmatprep.subr.bf16.mxu0 %v198_v12  ;;  %p230_p4 = pnand %p229_p3, %p223_p0 }
  0x11   :  { %201 = vmatpush3.bf16.msra.mxu0 %v198_v12 }
  0x12   :  { %203 = vmatprep.subr.bf16.mxu0 %v202_v15 }
  0x15   :  { %205 = vmatpush3.bf16.msra.mxu0 %v202_v15 }
  0x16   :  { %207 = vmatprep.subr.bf16.mxu0 %v206_v18 }
  0x19   :  { %209 = vmatpush3.bf16.msra.mxu0 %v206_v18 }
  0x1a   :  { %211 = vmatprep.subr.bf16.mxu0 %v210_v21 }
  0x1d   :  { %213 = vmatpush3.bf16.msra.mxu0 %v210_v21 }
  0x1e   :  { %215 = vmatprep.subr.bf16.mxu0 %v214_v24 }
  0x21   :  { %217 = vmatpush3.bf16.msra.mxu0 %v214_v24 }
  0x24   :  { %184 = vmatmul.mubr.f32.vlgmr.msra.gmra.mrb[0].mxu0 %v21_v25 }
  0xf7   :  { %v185_v26 = vpop.f32.mrb[0].mxu0 }
  0xf8   :  { %v104_v27 = vpop.f32.mrb[1].mxu0  ;;  %116 = vst [vmem:[#allocation2 + $0x8] sm:$0xff] %v185_v26 }
  0xf9   :  { %115 = vst [vmem:[#allocation2] sm:$0xff] %v104_v27 }
  0xfa   :  { %233 = shalt.err (!%p230_p4)
}
  0xfb   :  { %s234_s21 = scalar_lea.hbm %s332_s2, 256 }
  0xfc   :  { %p235_p5 = scmp.ne.s32.totalorder %s332_s2, %s234_s21  ;;  %p238_p6 = scmp.lt.u32.totalorder %s234_s21, %s332_s2 }
  0xfe   :  { %p240_p7 = pnand %p238_p6, %p235_p5 }
 0x100   :  { %243 = shalt.err (!%p240_p7)
}
 0x101   :  { %s247_s25 = smov 128   ;;  %s248_s26 = smov 8  }
 0x102   :  { %128 = dma.vmem_to_hbm [thread:$0]  %s123_s18, 256, %s332_s2, [#allocation3], %s247_s25, %s247_s25, %s248_s26  }
 0x103   :  { %244 = dma.done.wait [#allocation3], 256  }
 0x104   :  { %245 = vsyncadd [#allocation3], 4294967040 }
 0x105   :  { %132 = vsyncpa [#allocation3], 1 }

</bundles_post_ra>
